<compile_context>
chip_gen: v7x
topology: tpu7x:2x2x1
jax: 0.10.0
libtpu: 0.0.40
codegen_flags: <defaults>
</compile_context>

<pallas_src>
from functools import partial

import jax
import jax.numpy as jnp
from jax.experimental import pallas as pl
from jax.experimental.pallas import tpu as pltpu

LANE = 128
SUBLANE = 8


def _round_up(n, m):
    return ((n + m - 1) // m) * m


def _pad2(a, rows, cols):
    return jnp.pad(a, ((0, rows - a.shape[0]), (0, cols - a.shape[1])))


def dqn_kernel(x_ref,
               w1_ref, b1_ref,
               w2_ref, b2_ref,
               w3_ref, b3_ref,
               w4_ref, b4_ref,
               o_ref):
    cdt = w1_ref.dtype  # bf16 operands, f32 accumulation on the MXU

    x = x_ref[...].astype(cdt)

    # layer1 + relu
    h1 = jnp.dot(x, w1_ref[...], preferred_element_type=jnp.float32) + b1_ref[...]
    h1 = jnp.maximum(h1, 0.0)

    # layer2 + relu
    h2 = jnp.dot(h1.astype(cdt), w2_ref[...],
                 preferred_element_type=jnp.float32) + b2_ref[...]
    h2 = jnp.maximum(h2, 0.0)

    # layer3 + residual(h1) + relu
    h3 = jnp.dot(h2.astype(cdt), w3_ref[...],
                 preferred_element_type=jnp.float32) + b3_ref[...] + h1
    h3 = jnp.maximum(h3, 0.0)

    # layer4 (no activation)
    out = jnp.dot(h3.astype(cdt), w4_ref[...],
                  preferred_element_type=jnp.float32) + b4_ref[...]
    o_ref[...] = out.astype(o_ref.dtype)


def prepare_params(params, compute_dtype=jnp.bfloat16):
    """One-time weight preparation (pad hidden dim to 128 lanes, cast to bf16).

    Do this ONCE outside the act/train loop; only x then flows through the
    per-call wrapper, so per-step HBM traffic is just x + out + resident weights.
    Zero-padded weight columns/rows and zero bias entries keep the math exact.
    """
    w1, b1 = params["layer1"]
    w2, b2 = params["layer2"]
    w3, b3 = params["layer3"]
    w4, b4 = params["layer4"]

    d_in, h_dim = w1.shape
    n_actions = w4.shape[1]
    hp = _round_up(h_dim, LANE)

    def bias2d(b):
        return jnp.asarray(b).reshape(1, -1)

    prepped = {
        # K of layer1 stays the real d_in (matches unpadded x); N padded to 128.
        "w1": _pad2(w1, d_in, hp).astype(compute_dtype),
        "b1": _pad2(bias2d(b1), 1, hp).astype(jnp.float32),
        "w2": _pad2(w2, hp, hp).astype(compute_dtype),
        "b2": _pad2(bias2d(b2), 1, hp).astype(jnp.float32),
        "w3": _pad2(w3, hp, hp).astype(compute_dtype),
        "b3": _pad2(bias2d(b3), 1, hp).astype(jnp.float32),
        # Output dim stays the real n_actions (narrow store beats 32x writeback).
        "w4": _pad2(w4, hp, n_actions).astype(compute_dtype),
        "b4": bias2d(b4).astype(jnp.float32),
    }
    return prepped, h_dim


def dqn_forward(x, prepped, *, h_dim, tile_b=256):
    """x: [B, n_observations] f32; prepped: output of prepare_params."""
    w1p, b1p = prepped["w1"], prepped["b1"]
    w2p, b2p = prepped["w2"], prepped["b2"]
    w3p, b3p = prepped["w3"], prepped["b3"]
    w4p, b4p = prepped["w4"], prepped["b4"]

    B, d_in = x.shape
    hp = w1p.shape[1]
    n_actions = w4p.shape[1]

    # Batch tile: multiple of 16 rows (bf16 sublane packing), targeting >= 4
    # grid steps so megacore (v7x) shards work and x/out DMAs pipeline behind
    # compute; never larger than the sublane-rounded batch. Partial last tile
    # is handled by Pallas (OOB rows masked on store, sliced-off garbage only).
    tb = min(tile_b,
             max(_round_up(pl.cdiv(B, 4), 16), 16),
             _round_up(B, SUBLANE))
    grid = (pl.cdiv(B, tb),)

    # Weights/biases: full-array blocks, constant index_map -> VMEM-resident,
    # single-buffered (no point double-buffering a block whose index never changes).
    def resident(a):
        return pl.BlockSpec(a.shape, lambda i: (0,) * a.ndim,
                            pipeline_mode=pl.Buffered(1))

    in_specs = [
        pl.BlockSpec((tb, d_in), lambda i: (i, 0)),  # x: batch-tiled, full last dim
        resident(w1p), resident(b1p),
        resident(w2p), resident(b2p),
        resident(w3p), resident(b3p),
        resident(w4p), resident(b4p),
    ]
    out_specs = pl.BlockSpec((tb, n_actions), lambda i: (i, 0))

    weights_and_biases = (w1p, b1p, w2p, b2p, w3p, b3p, w4p, b4p)

    # Cost estimate from real (unpadded) dims.
    flops = 2 * B * (d_in * h_dim + 2 * h_dim * h_dim + h_dim * n_actions)
    weight_bytes = sum(int(a.size) * a.dtype.itemsize for a in weights_and_biases)
    bytes_accessed = B * d_in * 4 + weight_bytes + B * n_actions * 4

    # Explicit VMEM budget: resident weights (single-buffered) + double-buffered
    # x/out tiles + f32/bf16 activation scratch, with 2x headroom; clamped to a
    # range safe on v5e (16 MiB scoped default) through v7x (64 MiB physical).
    resident_bytes = weight_bytes
    stream_bytes = 2 * tb * d_in * 4 + 2 * tb * n_actions * 4
    act_bytes = 5 * tb * hp * 4
    vmem_limit = int(min(64 << 20,
                         max(16 << 20,
                             2 * (resident_bytes + stream_bytes + act_bytes))))

    return pl.pallas_call(
        dqn_kernel,
        out_shape=jax.ShapeDtypeStruct((B, n_actions), jnp.float32),
        grid=grid,
        in_specs=in_specs,
        out_specs=out_specs,
        compiler_params=pltpu.CompilerParams(
            dimension_semantics=("parallel",),  # megacore sharding on v7x
            vmem_limit_bytes=vmem_limit,
        ),
        cost_estimate=pl.CostEstimate(
            flops=flops, transcendentals=0, bytes_accessed=bytes_accessed),
    )(x, *weights_and_biases)


def init_params(key, n_observations, n_actions, h_dim):
    """Deterministic init mimicking nn.Linear default (uniform +-1/sqrt(fan_in))."""
    dims = [(n_observations, h_dim), (h_dim, h_dim), (h_dim, h_dim), (h_dim, n_actions)]
    names = ["layer1", "layer2", "layer3", "layer4"]
    params = {}
    for name, (fan_in, fan_out) in zip(names, dims):
        key, kw, kb = jax.random.split(key, 3)
        bound = 1.0 / (fan_in ** 0.5)
        w = jax.random.uniform(kw, (fan_in, fan_out), jnp.float32, -bound, bound)
        b = jax.random.uniform(kb, (1, fan_out), jnp.float32, -bound, bound)
        params[name] = (w, b)
    return params


def reference_forward(x, params, compute_dtype=jnp.bfloat16):
    """Pure-JAX reference mirroring the kernel's bf16-in / f32-accumulate matmuls."""
    w1, b1 = params["layer1"]
    w2, b2 = params["layer2"]
    w3, b3 = params["layer3"]
    w4, b4 = params["layer4"]

    def lin(h, w, b):
        return jnp.dot(h.astype(compute_dtype), w.astype(compute_dtype),
                       preferred_element_type=jnp.float32) + b

    h1 = jax.nn.relu(lin(x, w1, b1))
    h2 = jax.nn.relu(lin(h1, w2, b2))
    h3 = jax.nn.relu(lin(h2, w3, b3) + h1)
    return lin(h3, w4, b4)


if __name__ == "__main__":
    B = 8
    n_observations = 16
    n_actions = 4
    h_dim = 32

    key = jax.random.PRNGKey(0)
    key, kx = jax.random.split(key)
    x = jax.random.normal(kx, (B, n_observations), jnp.float32)
    params = init_params(key, n_observations, n_actions, h_dim)

    # One-time weight prep (pad + bf16 cast) outside the jitted forward.
    prepped, real_h_dim = prepare_params(params)
    fwd = jax.jit(partial(dqn_forward, h_dim=real_h_dim))

    out = jax.block_until_ready(fwd(x, prepped))

    ref = reference_forward(x, params)
    assert out.shape == (B, n_actions)
    assert jnp.allclose(out, ref, atol=2e-3, rtol=2e-3), "mismatch vs reference"

    print("KERNEL_OK")
</pallas_src>

<mosaic_0001>
module attributes {stable_mosaic.version = 11 : i64} {
  func.func @dqn_kernel(%arg0: i32, %arg1: memref<8x16xf32, #tpu.memory_space<vmem>>, %arg2: memref<16x128xbf16, #tpu.memory_space<vmem>>, %arg3: memref<1x128xf32, #tpu.memory_space<vmem>>, %arg4: memref<128x128xbf16, #tpu.memory_space<vmem>>, %arg5: memref<1x128xf32, #tpu.memory_space<vmem>>, %arg6: memref<128x128xbf16, #tpu.memory_space<vmem>>, %arg7: memref<1x128xf32, #tpu.memory_space<vmem>>, %arg8: memref<128x4xbf16, #tpu.memory_space<vmem>>, %arg9: memref<1x4xf32, #tpu.memory_space<vmem>>, %arg10: memref<8x4xf32, #tpu.memory_space<vmem>>) attributes {dimension_semantics = [#tpu.dimension_semantics<parallel>], iteration_bounds = array<i64: 1>, scalar_prefetch = 0 : i64, scratch_operands = 0 : i64, tpu.core_type = #tpu.core_type<tc>, window_params = [{transform_indices = @transform_0, window_bounds = array<i64: 8, 16>}, {pipeline_mode = #tpu.pipeline_mode<synchronous>, transform_indices = @transform_1, window_bounds = array<i64: 16, 128>}, {pipeline_mode = #tpu.pipeline_mode<synchronous>, transform_indices = @transform_2, window_bounds = array<i64: 1, 128>}, {pipeline_mode = #tpu.pipeline_mode<synchronous>, transform_indices = @transform_3, window_bounds = array<i64: 128, 128>}, {pipeline_mode = #tpu.pipeline_mode<synchronous>, transform_indices = @transform_4, window_bounds = array<i64: 1, 128>}, {pipeline_mode = #tpu.pipeline_mode<synchronous>, transform_indices = @transform_5, window_bounds = array<i64: 128, 128>}, {pipeline_mode = #tpu.pipeline_mode<synchronous>, transform_indices = @transform_6, window_bounds = array<i64: 1, 128>}, {pipeline_mode = #tpu.pipeline_mode<synchronous>, transform_indices = @transform_7, window_bounds = array<i64: 128, 4>}, {pipeline_mode = #tpu.pipeline_mode<synchronous>, transform_indices = @transform_8, window_bounds = array<i64: 1, 4>}, {transform_indices = @transform_9, window_bounds = array<i64: 8, 4>}]} {
    %c0 = arith.constant 0 : index
    %c0_0 = arith.constant 0 : index
    %0 = vector.load %arg1[%c0, %c0_0] : memref<8x16xf32, #tpu.memory_space<vmem>>, vector<8x16xf32>
    %1 = arith.truncf %0 : vector<8x16xf32> to vector<8x16xbf16>
    %c0_1 = arith.constant 0 : index
    %c0_2 = arith.constant 0 : index
    %2 = vector.load %arg2[%c0_1, %c0_2] : memref<16x128xbf16, #tpu.memory_space<vmem>>, vector<16x128xbf16>
    %cst = arith.constant dense<0.000000e+00> : vector<8x128xf32>
    %3 = tpu.matmul %1, %2, %cst {dimension_numbers = #tpu.dot_dimension_numbers<[1], [0], [0], [1], [0, 0, 1, 1], [], []>} : vector<8x16xbf16>, vector<16x128xbf16>, vector<8x128xf32> -> vector<8x128xf32>
    %c0_3 = arith.constant 0 : index
    %c0_4 = arith.constant 0 : index
    %4 = vector.load %arg3[%c0_3, %c0_4] : memref<1x128xf32, #tpu.memory_space<vmem>>, vector<1x128xf32>
    %5 = vector.broadcast %4 : vector<1x128xf32> to vector<8x128xf32>
    %6 = arith.addf %3, %5 : vector<8x128xf32>
    %cst_5 = arith.constant 0.000000e+00 : f32
    %7 = vector.broadcast %cst_5 : f32 to vector<8x128xf32>
    %8 = arith.maximumf %6, %7 : vector<8x128xf32>
    %9 = arith.truncf %8 : vector<8x128xf32> to vector<8x128xbf16>
    %c0_6 = arith.constant 0 : index
    %c0_7 = arith.constant 0 : index
    %10 = vector.load %arg4[%c0_6, %c0_7] : memref<128x128xbf16, #tpu.memory_space<vmem>>, vector<128x128xbf16>
    %cst_8 = arith.constant dense<0.000000e+00> : vector<8x128xf32>
    %11 = tpu.matmul %9, %10, %cst_8 {dimension_numbers = #tpu.dot_dimension_numbers<[1], [0], [0], [1], [0, 0, 1, 1], [], []>} : vector<8x128xbf16>, vector<128x128xbf16>, vector<8x128xf32> -> vector<8x128xf32>
    %c0_9 = arith.constant 0 : index
    %c0_10 = arith.constant 0 : index
    %12 = vector.load %arg5[%c0_9, %c0_10] : memref<1x128xf32, #tpu.memory_space<vmem>>, vector<1x128xf32>
    %13 = vector.broadcast %12 : vector<1x128xf32> to vector<8x128xf32>
    %14 = arith.addf %11, %13 : vector<8x128xf32>
    %cst_11 = arith.constant 0.000000e+00 : f32
    %15 = vector.broadcast %cst_11 : f32 to vector<8x128xf32>
    %16 = arith.maximumf %14, %15 : vector<8x128xf32>
    %17 = arith.truncf %16 : vector<8x128xf32> to vector<8x128xbf16>
    %c0_12 = arith.constant 0 : index
    %c0_13 = arith.constant 0 : index
    %18 = vector.load %arg6[%c0_12, %c0_13] : memref<128x128xbf16, #tpu.memory_space<vmem>>, vector<128x128xbf16>
    %cst_14 = arith.constant dense<0.000000e+00> : vector<8x128xf32>
    %19 = tpu.matmul %17, %18, %cst_14 {dimension_numbers = #tpu.dot_dimension_numbers<[1], [0], [0], [1], [0, 0, 1, 1], [], []>} : vector<8x128xbf16>, vector<128x128xbf16>, vector<8x128xf32> -> vector<8x128xf32>
    %c0_15 = arith.constant 0 : index
    %c0_16 = arith.constant 0 : index
    %20 = vector.load %arg7[%c0_15, %c0_16] : memref<1x128xf32, #tpu.memory_space<vmem>>, vector<1x128xf32>
    %21 = vector.broadcast %20 : vector<1x128xf32> to vector<8x128xf32>
    %22 = arith.addf %19, %21 : vector<8x128xf32>
    %23 = arith.addf %22, %8 : vector<8x128xf32>
    %cst_17 = arith.constant 0.000000e+00 : f32
    %24 = vector.broadcast %cst_17 : f32 to vector<8x128xf32>
    %25 = arith.maximumf %23, %24 : vector<8x128xf32>
    %26 = arith.truncf %25 : vector<8x128xf32> to vector<8x128xbf16>
    %c0_18 = arith.constant 0 : index
    %c0_19 = arith.constant 0 : index
    %27 = vector.load %arg8[%c0_18, %c0_19] : memref<128x4xbf16, #tpu.memory_space<vmem>>, vector<128x4xbf16>
    %cst_20 = arith.constant dense<0.000000e+00> : vector<8x4xf32>
    %28 = tpu.matmul %26, %27, %cst_20 {dimension_numbers = #tpu.dot_dimension_numbers<[1], [0], [0], [1], [0, 0, 1, 1], [], []>} : vector<8x128xbf16>, vector<128x4xbf16>, vector<8x4xf32> -> vector<8x4xf32>
    %c0_21 = arith.constant 0 : index
    %c0_22 = arith.constant 0 : index
    %29 = vector.load %arg9[%c0_21, %c0_22] : memref<1x4xf32, #tpu.memory_space<vmem>>, vector<1x4xf32>
    %30 = vector.broadcast %29 : vector<1x4xf32> to vector<8x4xf32>
    %31 = arith.addf %28, %30 : vector<8x4xf32>
    %c0_23 = arith.constant 0 : index
    %c0_24 = arith.constant 0 : index
    %32 = vector.load %arg10[%c0_23, %c0_24] : memref<8x4xf32, #tpu.memory_space<vmem>>, vector<8x4xf32>
    tpu.vector_store %arg10[%c0_23, %c0_24], %31 {strides = array<i32>} : memref<8x4xf32, #tpu.memory_space<vmem>>, vector<8x4xf32>,
    return
  }
  func.func @transform_0(%arg0: i32) -> (i32, i32) {
    %c0_i32 = arith.constant 0 : i32
    %c0_i32_0 = arith.constant 0 : i32
    return %arg0, %c0_i32 : i32, i32
  }
  func.func @transform_1(%arg0: i32) -> (i32, i32) {
    %c0_i32 = arith.constant 0 : i32
    %c0_i32_0 = arith.constant 0 : i32
    %c0_i32_1 = arith.constant 0 : i32
    return %c0_i32, %c0_i32_0 : i32, i32
  }
  func.func @transform_2(%arg0: i32) -> (i32, i32) {
    %c0_i32 = arith.constant 0 : i32
    %c0_i32_0 = arith.constant 0 : i32
    %c0_i32_1 = arith.constant 0 : i32
    return %c0_i32, %c0_i32_0 : i32, i32
  }
  func.func @transform_3(%arg0: i32) -> (i32, i32) {
    %c0_i32 = arith.constant 0 : i32
    %c0_i32_0 = arith.constant 0 : i32
    %c0_i32_1 = arith.constant 0 : i32
    return %c0_i32, %c0_i32_0 : i32, i32
  }
  func.func @transform_4(%arg0: i32) -> (i32, i32) {
    %c0_i32 = arith.constant 0 : i32
    %c0_i32_0 = arith.constant 0 : i32
    %c0_i32_1 = arith.constant 0 : i32
    return %c0_i32, %c0_i32_0 : i32, i32
  }
  func.func @transform_5(%arg0: i32) -> (i32, i32) {
    %c0_i32 = arith.constant 0 : i32
    %c0_i32_0 = arith.constant 0 : i32
    %c0_i32_1 = arith.constant 0 : i32
    return %c0_i32, %c0_i32_0 : i32, i32
  }
  func.func @transform_6(%arg0: i32) -> (i32, i32) {
    %c0_i32 = arith.constant 0 : i32
    %c0_i32_0 = arith.constant 0 : i32
    %c0_i32_1 = arith.constant 0 : i32
    return %c0_i32, %c0_i32_0 : i32, i32
  }
  func.func @transform_7(%arg0: i32) -> (i32, i32) {
    %c0_i32 = arith.constant 0 : i32
    %c0_i32_0 = arith.constant 0 : i32
    %c0_i32_1 = arith.constant 0 : i32
    return %c0_i32, %c0_i32_0 : i32, i32
  }
  func.func @transform_8(%arg0: i32) -> (i32, i32) {
    %c0_i32 = arith.constant 0 : i32
    %c0_i32_0 = arith.constant 0 : i32
    %c0_i32_1 = arith.constant 0 : i32
    return %c0_i32, %c0_i32_0 : i32, i32
  }
  func.func @transform_9(%arg0: i32) -> (i32, i32) {
    %c0_i32 = arith.constant 0 : i32
    %c0_i32_0 = arith.constant 0 : i32
    return %arg0, %c0_i32 : i32, i32
  }
}

</mosaic_0001>

<bundles_post_ra>
// kernel: dqn_forward.1
= control target key start
LH: loop header
LB: loop body
LE: loop exit
PB: predicated region body
PF: predicated region fallthrough
CT: control target
= control target key end

     0   :  { %14 = vsyncpa [#allocation3], 0  ;;  %s634_s30 = smov [#allocation2]   ;;  %s803_s0 = inlined_call_operand.vmem [shape: f32[8,16], index: 0, kind: input, shape index: {}]   ;;  %s804_s1 = inlined_call_operand.vmem [shape: bf16[16,128], index: 1, kind: input, shape index: {}]   ;;  %s805_s2 = inlined_call_operand.vmem [shape: f32[1,128], index: 2, kind: input, shape index: {}]   ;;  %s806_s3 = inlined_call_operand.vmem [shape: bf16[128,128], index: 3, kind: input, shape index: {}]   ;;  %s807_s4 = inlined_call_operand.vmem [shape: f32[1,128], index: 4, kind: input, shape index: {}]   ;;  %s808_s5 = inlined_call_operand.hbm [shape: bf16[128,128], index: 5, kind: input, shape index: {}]   ;;  %s809_s6 = inlined_call_operand.vmem [shape: f32[1,128], index: 6, kind: input, shape index: {}]   ;;  %s810_s7 = inlined_call_operand.vmem [shape: bf16[128,4], index: 7, kind: input, shape index: {}]   ;;  %s811_s8 = inlined_call_operand.vmem [shape: f32[1,4], index: 8, kind: input, shape index: {}]   ;;  %s812_s9 = inlined_call_operand.vmem [shape: f32[8,4], index: 9, kind: output, shape index: {}]  }
   0x1   :  { %s30_s10 = sshll.u32 %s634_s30, 4  ;;  %s610_s13 = scalar_lea.hbm %s808_s5, 1024  ;;  %s31_s10 = int_to_ptr.vmem [resolvable:$true] %s30_s10 }
   0x2   :  { %p611_p0 = scmp.ne.s32.totalorder %s808_s5, %s610_s13  ;;  %p614_p1 = scmp.lt.u32.totalorder %s610_s13, %s808_s5 }
   0x4   :  { %p616_p2 = pnand %p614_p1, %p611_p0 }
   0x6   :  { %619 = shalt.err (!%p616_p2)
}
   0x7   :  { %s620_s18 = scalar_lea.vmem %s31_s10, 1024  ;;  %p625_p4 = scmp.lt.s32.totalorder %s31_s10, %s31_s10 }
   0x8   :  { %p621_p3 = scmp.ne.s32.totalorder %s31_s10, %s620_s18  ;;  %p626_p5 = scmp.lt.s32.totalorder %s620_s18, %s620_s18 }
   0xa   :  { %p627_p6 = por %p626_p5, %p625_p4 }
   0xc   :  { %p628_p7 = pnand %p627_p6, %p621_p3 }
   0xe   :  { %631 = shalt.err (!%p628_p7)
}
   0xf   :  { %s635_s19 = smov 64   ;;  %s636_s20 = smov 4  }
  0x10   :  { %36 = dma.hbm_to_vmem [thread:$0]  %s808_s5, 1024, %s31_s10, [#allocation3], %s635_s19, %s635_s19, %s636_s20  }
  0x11   :  { %632 = dma.done.wait [#allocation3], 1024  }
  0x12   :  { %633 = vsyncadd [#allocation3], 4294966272  ;;  %v637_v0 = vmov 0.0   ;;  %vm638_vm0 = vmmov 0   ;;  %v585_v1 = vld [vmem:[%s804_s1] sm:$0xff]   ;;  %vm64_vm1 = vcmask 130048  }
  0x13   :  { %514 = vmatprep.subr.bf16.mxu0 %v637_v0  ;;  %516 = vmatprep.mubr.msk.bf16.mxu0 %vm638_vm0, %v637_v0  ;;  %v47_v2 = vld [vmem:[%s803_s0] sm:$0xff]  ;;  %v587_v5 = vld [vmem:[%s806_s3 + $0x8] sm:$0xff]   ;;  %v588_v6 = vld [vmem:[%s806_s3 + $0x10] sm:$0xff]   ;;  %vm448_vm2 = vcmask 31744  }
  0x14   :  { %520 = vmatprep.subr.bf16.mxu1 %v637_v0  ;;  %536 = vmatprep.mubr.msk.bf16.mxu1 %vm638_vm0, %v637_v0  ;;  %v48_v3 = vpack.c.bf16 %v47_v2, %v47_v2  ;;  %v586_v4 = vld [vmem:[%s806_s3] sm:$0xff]   ;;  %v589_v7 = vld [vmem:[%s806_s3 + $0x18] sm:$0xff]   ;;  %v591_v9 = vld [vmem:[%s806_s3 + $0x28] sm:$0xff]  }
  0x15   :  { %515 = vmatpush3.bf16.msra.mxu0 %v585_v1  ;;  %521 = vmatpush3.bf16.msra.mxu1 %v586_v4  ;;  %v590_v8 = vld [vmem:[%s806_s3 + $0x20] sm:$0xff]   ;;  %v592_v10 = vld [vmem:[%s806_s3 + $0x30] sm:$0xff]   ;;  %v593_v11 = vld [vmem:[%s806_s3 + $0x38] sm:$0xff]  }
  0x16   :  { %540 = vmatprep.subr.bf16.mxu0 %v637_v0  ;;  %522 = vmatprep.subr.bf16.mxu1 %v637_v0  ;;  %v594_v12 = vld [vmem:[#allocation2] sm:$0xff]   ;;  %v595_v13 = vld [vmem:[#allocation2 + $0x8] sm:$0xff]   ;;  %v596_v14 = vld [vmem:[#allocation2 + $0x10] sm:$0xff]  }
  0x17   :  { %v597_v15 = vld [vmem:[#allocation2 + $0x18] sm:$0xff]   ;;  %v598_v16 = vld [vmem:[#allocation2 + $0x20] sm:$0xff]   ;;  %v599_v17 = vld [vmem:[#allocation2 + $0x28] sm:$0xff]  }
  0x18   :  { %517 = vmatmul.mubr.msk.bf16.vlgmr.msra.gmra.mrb[0].mxu0 %vm64_vm1, %v48_v3  ;;  %v455_v18 = vld [vmem:[%s805_s2] ss:$0 sm:$0xff]  ;;  %v600_v26 = vld [vmem:[#allocation2 + $0x30] sm:$0xff]   ;;  %v601_v27 = vld [vmem:[#allocation2 + $0x38] sm:$0xff]  }
  0x19   :  { %556 = vmatprep.mubr.msk.bf16.mxu0 %vm638_vm0, %v637_v0  ;;  %523 = vmatpush3.bf16.msra.mxu1 %v587_v5  ;;  %v602_v28 = vld [vmem:[%s810_s7] sm:$0xff]   ;;  %v603_v29 = vld [vmem:[%s810_s7 + $0x8] sm:$0xff]   ;;  %v604_v30 = vld [vmem:[%s810_s7 + $0x10] sm:$0xff]  }
  0x1a   :  { %524 = vmatprep.subr.bf16.mxu1 %v637_v0  ;;  %541 = vmatpush3.bf16.msra.mxu0 %v594_v12  ;;  %v605_v31 = vld [vmem:[%s810_s7 + $0x18] sm:$0xff]   ;;  %v606_v32 = vld [vmem:[%s810_s7 + $0x20] sm:$0xff]   ;;  %v607_v33 = vld [vmem:[%s810_s7 + $0x28] sm:$0xff]  }
  0x1b   :  { %542 = vmatprep.subr.bf16.mxu0 %v637_v0  ;;  %v458_v34 = vld [vmem:[%s807_s4] ss:$0 sm:$0xff]  ;;  %v608_v42 = vld [vmem:[%s810_s7 + $0x30] sm:$0xff]   ;;  %v609_v43 = vld [vmem:[%s810_s7 + $0x38] sm:$0xff]  }
  0x1c   :  { %v467_v44 = vld [vmem:[%s809_s6] ss:$0 sm:$0xff] }
  0x1d   :  { %525 = vmatpush3.bf16.msra.mxu1 %v588_v6  ;;  %v476_v53 = vld [vmem:[%s811_s8] ss:$0 sm:$0xff] }
  0x1e   :  { %526 = vmatprep.subr.bf16.mxu1 %v637_v0  ;;  %543 = vmatpush3.bf16.msra.mxu0 %v595_v13 }
  0x1f   :  { %544 = vmatprep.subr.bf16.mxu0 %v637_v0 }
  0x21   :  { %527 = vmatpush3.bf16.msra.mxu1 %v589_v7 }
  0x22   :  { %528 = vmatprep.subr.bf16.mxu1 %v637_v0  ;;  %545 = vmatpush3.bf16.msra.mxu0 %v596_v14 }
  0x23   :  { %546 = vmatprep.subr.bf16.mxu0 %v637_v0 }
  0x25   :  { %529 = vmatpush3.bf16.msra.mxu1 %v590_v8 }
  0x26   :  { %530 = vmatprep.subr.bf16.mxu1 %v637_v0  ;;  %547 = vmatpush3.bf16.msra.mxu0 %v597_v15 }
  0x27   :  { %548 = vmatprep.subr.bf16.mxu0 %v637_v0 }
  0x29   :  { %531 = vmatpush3.bf16.msra.mxu1 %v591_v9 }
  0x2a   :  { %532 = vmatprep.subr.bf16.mxu1 %v637_v0  ;;  %549 = vmatpush3.bf16.msra.mxu0 %v598_v16 }
  0x2b   :  { %550 = vmatprep.subr.bf16.mxu0 %v637_v0 }
  0x2d   :  { %533 = vmatpush3.bf16.msra.mxu1 %v592_v10 }
  0x2e   :  { %534 = vmatprep.subr.bf16.mxu1 %v637_v0  ;;  %551 = vmatpush3.bf16.msra.mxu0 %v599_v17 }
  0x2f   :  { %552 = vmatprep.subr.bf16.mxu0 %v637_v0 }
  0x31   :  { %535 = vmatpush3.bf16.msra.mxu1 %v593_v11 }
  0x32   :  { %560 = vmatprep.subr.bf16.mxu1 %v637_v0  ;;  %553 = vmatpush3.bf16.msra.mxu0 %v600_v26 }
  0x33   :  { %554 = vmatprep.subr.bf16.mxu0 %v637_v0 }
  0x36   :  { %555 = vmatpush3.bf16.msra.mxu0 %v601_v27 }
  0xeb   :  { %v102_v19 = vpop.f32.mrb[0].mxu0 }
  0xec   :  { %v103_v20 = vadd.f32 %v455_v18, %v102_v19  ;;  %v518_v21 = vpop.f32.mrb[1].mxu0 }
  0xed   :  { %v105_v22 = vpop.f32.mrb[2].mxu0 }
  0xee   :  { %v108_v23 = vmax.f32 %v103_v20, 0.0  ;;  %v519_v24 = vpop.f32.mrb[3].mxu0 }
  0xf0   :  { %v109_v25 = vpack.c.bf16 %v108_v23, %v108_v23 }
  0xf2   :  { %537 = vmatmul.mubr.bf16.vlgmr.msra.gmra.mrb[0].mxu1 %v109_v25 }
  0xf3   :  { %576 = vmatprep.mubr.msk.bf16.mxu1 %vm638_vm0, %v637_v0  ;;  %561 = vmatpush3.bf16.msra.mxu1 %v602_v28 }
  0xf4   :  { %562 = vmatprep.subr.bf16.mxu1 %v637_v0 }
  0xf7   :  { %563 = vmatpush3.bf16.msra.mxu1 %v603_v29 }
  0xf8   :  { %564 = vmatprep.subr.bf16.mxu1 %v637_v0 }
  0xfb   :  { %565 = vmatpush3.bf16.msra.mxu1 %v604_v30 }
  0xfc   :  { %566 = vmatprep.subr.bf16.mxu1 %v637_v0 }
  0xff   :  { %567 = vmatpush3.bf16.msra.mxu1 %v605_v31 }
 0x100   :  { %568 = vmatprep.subr.bf16.mxu1 %v637_v0 }
 0x103   :  { %569 = vmatpush3.bf16.msra.mxu1 %v606_v32 }
 0x104   :  { %570 = vmatprep.subr.bf16.mxu1 %v637_v0 }
 0x107   :  { %571 = vmatpush3.bf16.msra.mxu1 %v607_v33 }
 0x108   :  { %572 = vmatprep.subr.bf16.mxu1 %v637_v0 }
 0x10b   :  { %573 = vmatpush3.bf16.msra.mxu1 %v608_v42 }
 0x10c   :  { %574 = vmatprep.subr.bf16.mxu1 %v637_v0 }
 0x10f   :  { %575 = vmatpush3.bf16.msra.mxu1 %v609_v43 }
 0x1c5   :  { %v215_v35 = vpop.f32.mrb[0].mxu1 }
 0x1c6   :  { %v216_v36 = vadd.f32 %v458_v34, %v215_v35  ;;  %v538_v37 = vpop.f32.mrb[1].mxu1 }
 0x1c7   :  { %v218_v38 = vpop.f32.mrb[2].mxu1 }
 0x1c8   :  { %v221_v39 = vmax.f32 %v216_v36, 0.0  ;;  %v539_v40 = vpop.f32.mrb[3].mxu1 }
 0x1ca   :  { %v222_v41 = vpack.c.bf16 %v221_v39, %v221_v39 }
 0x1cc   :  { %557 = vmatmul.mubr.bf16.vlgmr.msra.gmra.mrb[4].mxu0 %v222_v41 }
 0x29f   :  { %v328_v45 = vpop.f32.mrb[4].mxu0 }
 0x2a0   :  { %v329_v46 = vadd.f32 %v467_v44, %v328_v45  ;;  %v558_v47 = vpop.f32.mrb[5].mxu0 }
 0x2a1   :  { %v331_v48 = vpop.f32.mrb[6].mxu0 }
 0x2a2   :  { %v334_v49 = vadd.f32 %v329_v46, %v108_v23  ;;  %v559_v50 = vpop.f32.mrb[7].mxu0 }
 0x2a4   :  { %v335_v51 = vmax.f32 %v334_v49, 0.0 }
 0x2a6   :  { %v336_v52 = vpack.c.bf16 %v335_v51, %v335_v51 }
 0x2a8   :  { %577 = vmatmul.mubr.bf16.vlgmr.msra.gmra.mrb[4].mxu1 %v336_v52 }
 0x37b   :  { %v442_v54 = vpop.f32.mrb[4].mxu1 }
 0x37c   :  { %v443_v55 = vadd.f32 %v476_v53, %v442_v54  ;;  %v578_v56 = vpop.f32.mrb[5].mxu1 }
 0x37d   :  { %v445_v57 = vpop.f32.mrb[6].mxu1 }
 0x37e   :  { %449 = vst.msk [vmem:[%s812_s9] sm:$0xff] %vm448_vm2, %v443_v55  ;;  %v579_v58 = vpop.f32.mrb[7].mxu1 }
 0x37f   :  { %454 = vsyncpa [#allocation3], 1 }

</bundles_post_ra>
